<compile_context>
chip_gen: v7x
topology: tpu7x:2x2x1
jax: 0.10.0
libtpu: 0.0.40
codegen_flags: <defaults>
</compile_context>

<pallas_src>
import functools

import jax
import jax.numpy as jnp
from jax import lax
from jax.experimental import pallas as pl
from jax.experimental.pallas import tpu as pltpu


def _round_up(x, m):
    return ((x + m - 1) // m) * m


def _mse_partial_kernel(x_ref, t_ref, part_ref, acc_ref, *,
                        block_rows, steps_per_core, rows, needs_mask):
    """Accumulate sum((x - t)^2) per core into an (8, 128) vreg accumulator."""
    c = pl.program_id(0)   # core / parallel axis
    i = pl.program_id(1)   # reduction axis (arbitrary)

    @pl.when(i == 0)
    def _():
        acc_ref[...] = jnp.zeros_like(acc_ref)

    d = x_ref[...].astype(jnp.float32) - t_ref[...].astype(jnp.float32)
    sq = d * d

    if needs_mask:
        # Zero out rows past the logical end (edge block and/or extra core step).
        start = (c * steps_per_core + i) * block_rows
        row_idx = start + lax.broadcasted_iota(jnp.int32, sq.shape, 0)
        sq = jnp.where(row_idx < rows, sq, 0.0)

    # (block_rows, 128) -> (8, 128): leading-axis sum is pure vreg (VPU) adds,
    # no XLU work in the hot loop.
    acc_ref[...] += jnp.sum(sq.reshape(-1, 8, sq.shape[-1]), axis=0)

    @pl.when(i == pl.num_programs(1) - 1)
    def _():
        part_ref[...] = acc_ref[...]


def content_loss(inp, target, *, block_rows=2048, lane=128, num_cores=2):
    """Returns (inp, loss) where loss = mean((inp - target)**2).

    `inp` is returned unchanged (pass-through), matching ContentLoss.forward.
    """
    assert inp.shape == target.shape, "input and target must have the same shape"
    n_total = inp.size
    rows, rem = divmod(n_total, lane)

    flat_x = inp.reshape(-1)
    flat_t = target.reshape(-1)

    # Any remainder (< 128 elements) is handled with a tiny plain-JAX sum.
    if rem:
        tx = flat_x[rows * lane:].astype(jnp.float32)
        tt = flat_t[rows * lane:].astype(jnp.float32)
        tail_sum = jnp.sum((tx - tt) ** 2)
    else:
        tail_sum = jnp.float32(0.0)

    if rows == 0:
        return inp, tail_sum / jnp.float32(n_total)

    if rem:
        # TODO(synk): this slice copies the bulk when n_total % 128 != 0;
        # typical feature maps hit the rem == 0 fast path (zero extra copies).
        x2d = flat_x[: rows * lane].reshape(rows, lane)
        t2d = flat_t[: rows * lane].reshape(rows, lane)
    else:
        x2d = flat_x.reshape(rows, lane)
        t2d = flat_t.reshape(rows, lane)

    # Block sizing: row count is a multiple of 8 (tile-legal); capped at
    # block_rows so VMEM stays tiny even with double-buffering.
    br = min(block_rows, _round_up(rows, 8))
    steps_total = pl.cdiv(rows, br)

    # Leading parallel axis for v7x's 2 TensorCores; sequential no-op on 1-TC chips.
    nc = min(num_cores, steps_total)
    steps_per_core = pl.cdiv(steps_total, nc)
    covered_rows = nc * steps_per_core * br
    needs_mask = covered_rows > rows

    if nc * steps_per_core == steps_total:
        def in_map(c, i):
            return (c * steps_per_core + i, 0)
    else:
        last_blk = steps_total - 1

        def in_map(c, i):
            # Clamp extra core steps onto the last valid block; their rows are
            # fully masked inside the kernel, so they contribute zero.
            return (jnp.minimum(c * steps_per_core + i, last_blk), 0)

    kernel = functools.partial(
        _mse_partial_kernel,
        block_rows=br,
        steps_per_core=steps_per_core,
        rows=rows,
        needs_mask=needs_mask,
    )

    partials = pl.pallas_call(
        kernel,
        out_shape=jax.ShapeDtypeStruct((nc * 8, lane), jnp.float32),
        grid_spec=pltpu.PrefetchScalarGridSpec(
            num_scalar_prefetch=0,
            grid=(nc, steps_per_core),
            in_specs=[
                pl.BlockSpec((br, lane), in_map),
                pl.BlockSpec((br, lane), in_map),
            ],
            out_specs=pl.BlockSpec((8, lane), lambda c, i: (c, 0)),
            scratch_shapes=[pltpu.VMEM((8, lane), jnp.float32)],
        ),
        compiler_params=pltpu.CompilerParams(
            dimension_semantics=("parallel", "arbitrary"),
        ),
    )(x2d, t2d)

    # Single cheap final reduction (tiny array) + mean.
    loss = (jnp.sum(partials) + tail_sum) / jnp.float32(n_total)
    return inp, loss


if __name__ == "__main__":
    key = jax.random.PRNGKey(0)
    k_inp, k_tgt = jax.random.split(key)

    # Small NCHW feature map, consistent with the module's usage.
    shape = (2, 4, 16, 16)
    inp = jax.random.normal(k_inp, shape, dtype=jnp.float32)
    target = jax.random.normal(k_tgt, shape, dtype=jnp.float32)

    out, loss = content_loss(inp, target)
    jax.block_until_ready((out, loss))

    ref_loss = jnp.mean((inp - target) ** 2)
    assert jnp.allclose(loss, ref_loss, rtol=1e-6, atol=1e-6), (loss, ref_loss)
    assert jnp.array_equal(out, inp)

    # Extra validation exercising the multi-block / 2-core / masked-edge path
    # (still small: ~1.2 MB per tensor).
    shape2 = (4, 18, 64, 64)
    k1, k2 = jax.random.split(k_tgt)
    inp2 = jax.random.normal(k1, shape2, dtype=jnp.float32)
    tgt2 = jax.random.normal(k2, shape2, dtype=jnp.float32)
    out2, loss2 = content_loss(inp2, tgt2)
    jax.block_until_ready((out2, loss2))
    ref2 = jnp.mean((inp2 - tgt2) ** 2)
    assert jnp.allclose(loss2, ref2, rtol=1e-5, atol=1e-6), (loss2, ref2)
    assert jnp.array_equal(out2, inp2)

    print("KERNEL_OK")
</pallas_src>

<mosaic_0001>
module attributes {stable_mosaic.version = 11 : i64} {
  func.func @_mse_partial_kernel(%arg0: i32, %arg1: i32, %arg2: memref<16x128xf32, #tpu.memory_space<vmem>>, %arg3: memref<16x128xf32, #tpu.memory_space<vmem>>, %arg4: memref<8x128xf32, #tpu.memory_space<vmem>>, %arg5: memref<8x128xf32, #tpu.memory_space<vmem>>) attributes {dimension_semantics = [#tpu.dimension_semantics<parallel>, #tpu.dimension_semantics<arbitrary>], iteration_bounds = array<i64: 1, 1>, scalar_prefetch = 0 : i64, scratch_operands = 1 : i64, tpu.core_type = #tpu.core_type<tc>, window_params = [{transform_indices = @transform_0, window_bounds = array<i64: 16, 128>}, {transform_indices = @transform_1, window_bounds = array<i64: 16, 128>}, {transform_indices = @transform_2, window_bounds = array<i64: 8, 128>}]} {
    %c0_i32 = arith.constant 0 : i32
    %0 = arith.cmpi eq, %arg1, %c0_i32 : i32
    %1 = arith.extui %0 : i1 to i32
    %c0_i32_0 = arith.constant 0 : i32
    %2 = arith.cmpi ne, %1, %c0_i32_0 : i32
    scf.if %2 {
      %cst_10 = arith.constant 0.000000e+00 : f32
      %15 = vector.broadcast %cst_10 : f32 to vector<8x128xf32>
      %c0_11 = arith.constant 0 : index
      %c0_12 = arith.constant 0 : index
      %16 = vector.load %arg5[%c0_11, %c0_12] : memref<8x128xf32, #tpu.memory_space<vmem>>, vector<8x128xf32>
      tpu.vector_store %arg5[%c0_11, %c0_12], %15 {strides = array<i32>} : memref<8x128xf32, #tpu.memory_space<vmem>>, vector<8x128xf32>,
    } else {
    }
    %c0 = arith.constant 0 : index
    %c0_1 = arith.constant 0 : index
    %3 = vector.load %arg2[%c0, %c0_1] : memref<16x128xf32, #tpu.memory_space<vmem>>, vector<16x128xf32>
    %c0_2 = arith.constant 0 : index
    %c0_3 = arith.constant 0 : index
    %4 = vector.load %arg3[%c0_2, %c0_3] : memref<16x128xf32, #tpu.memory_space<vmem>>, vector<16x128xf32>
    %5 = arith.subf %3, %4 : vector<16x128xf32>
    %6 = arith.mulf %5, %5 : vector<16x128xf32>
    %c0_4 = arith.constant 0 : index
    %c0_5 = arith.constant 0 : index
    %7 = vector.load %arg5[%c0_4, %c0_5] : memref<8x128xf32, #tpu.memory_space<vmem>>, vector<8x128xf32>
    %8 = vector.shape_cast %6 : vector<16x128xf32> to vector<2x8x128xf32>
    %cst = arith.constant dense<0.000000e+00> : vector<8x128xf32>
    %9 = vector.multi_reduction <add>, %8, %cst [0] : vector<2x8x128xf32> to vector<8x128xf32>
    %10 = arith.addf %7, %9 : vector<8x128xf32>
    %c0_6 = arith.constant 0 : index
    %c0_7 = arith.constant 0 : index
    %11 = vector.load %arg5[%c0_6, %c0_7] : memref<8x128xf32, #tpu.memory_space<vmem>>, vector<8x128xf32>
    tpu.vector_store %arg5[%c0_6, %c0_7], %10 {strides = array<i32>} : memref<8x128xf32, #tpu.memory_space<vmem>>, vector<8x128xf32>,
    %c0_i32_8 = arith.constant 0 : i32
    %12 = arith.cmpi eq, %arg1, %c0_i32_8 : i32
    %13 = arith.extui %12 : i1 to i32
    %c0_i32_9 = arith.constant 0 : i32
    %14 = arith.cmpi ne, %13, %c0_i32_9 : i32
    scf.if %14 {
      %c0_10 = arith.constant 0 : index
      %c0_11 = arith.constant 0 : index
      %15 = vector.load %arg5[%c0_10, %c0_11] : memref<8x128xf32, #tpu.memory_space<vmem>>, vector<8x128xf32>
      %c0_12 = arith.constant 0 : index
      %c0_13 = arith.constant 0 : index
      %16 = vector.load %arg4[%c0_12, %c0_13] : memref<8x128xf32, #tpu.memory_space<vmem>>, vector<8x128xf32>
      tpu.vector_store %arg4[%c0_12, %c0_13], %15 {strides = array<i32>} : memref<8x128xf32, #tpu.memory_space<vmem>>, vector<8x128xf32>,
    } else {
    }
    return
  }
  func.func @transform_0(%arg0: i32, %arg1: i32) -> (i32, i32) {
    %c1_i32 = arith.constant 1 : i32
    %0 = arith.muli %arg0, %c1_i32 : i32
    %1 = arith.addi %0, %arg1 : i32
    %c0_i32 = arith.constant 0 : i32
    %c0_i32_0 = arith.constant 0 : i32
    return %1, %c0_i32 : i32, i32
  }
  func.func @transform_1(%arg0: i32, %arg1: i32) -> (i32, i32) {
    %c1_i32 = arith.constant 1 : i32
    %0 = arith.muli %arg0, %c1_i32 : i32
    %1 = arith.addi %0, %arg1 : i32
    %c0_i32 = arith.constant 0 : i32
    %c0_i32_0 = arith.constant 0 : i32
    return %1, %c0_i32 : i32, i32
  }
  func.func @transform_2(%arg0: i32, %arg1: i32) -> (i32, i32) {
    %c0_i32 = arith.constant 0 : i32
    %c0_i32_0 = arith.constant 0 : i32
    return %arg0, %c0_i32 : i32, i32
  }
}

</mosaic_0001>

<bundles_post_ra>
// kernel: tpu_custom_call.1
= control target key start
LH: loop header
LB: loop body
LE: loop exit
PB: predicated region body
PF: predicated region fallthrough
CT: control target
= control target key end

     0   :  { %7 = vsyncpa [#allocation4], 0  ;;  %s223_s0 = inlined_call_operand.hbm [shape: f32[16,128], index: 0, kind: input, shape index: {}]   ;;  %s224_s1 = inlined_call_operand.hbm [shape: f32[16,128], index: 1, kind: input, shape index: {}]   ;;  %s225_s2 = inlined_call_operand.hbm [shape: f32[8,128], index: 2, kind: output, shape index: {}]  }
   0x1   :  { %8 = vsyncpa [#allocation7], 0 }
   0x2   :  { %9 = vsyncpa [#allocation5], 0  ;;  %s167_s9 = smov [#allocation3]   ;;  %s95_s13 = scalar_lea.hbm %s223_s0, 256 }
   0x3   :  { %s19_s10 = sshll.u32 %s167_s9, 4  ;;  %p96_p0 = scmp.ne.s32.totalorder %s223_s0, %s95_s13  ;;  %s20_s10 = int_to_ptr.vmem [resolvable:$true] %s19_s10 }
   0x4   :  { %p99_p1 = scmp.lt.u32.totalorder %s95_s13, %s223_s0 }
   0x6   :  { %p101_p2 = pnand %p99_p1, %p96_p0 }
   0x8   :  { %104 = shalt.err (!%p101_p2)
}
   0x9   :  { %s105_s18 = scalar_lea.vmem %s20_s10, 256  ;;  %p110_p4 = scmp.lt.s32.totalorder %s20_s10, %s20_s10 }
   0xa   :  { %p106_p3 = scmp.ne.s32.totalorder %s20_s10, %s105_s18  ;;  %p111_p5 = scmp.lt.s32.totalorder %s105_s18, %s105_s18 }
   0xc   :  { %p112_p6 = por %p111_p5, %p110_p4 }
   0xe   :  { %p113_p7 = pnand %p112_p6, %p106_p3 }
  0x10   :  { %116 = shalt.err (!%p113_p7)
}
  0x11   :  { %s168_s19 = smov 128   ;;  %s169_s20 = smov 8  }
  0x12   :  { %25 = dma.hbm_to_vmem [thread:$0]  %s223_s0, 256, %s20_s10, [#allocation4], %s168_s19, %s168_s19, %s169_s20  }
  0x13   :  { %s170_s23 = smov [#allocation6]   ;;  %s117_s27 = scalar_lea.hbm %s224_s1, 256 }
  0x14   :  { %s35_s24 = sshll.u32 %s170_s23, 4  ;;  %p118_p8 = scmp.ne.s32.totalorder %s224_s1, %s117_s27  ;;  %s36_s24 = int_to_ptr.vmem [resolvable:$true] %s35_s24 }
  0x15   :  { %p121_p9 = scmp.lt.u32.totalorder %s117_s27, %s224_s1 }
  0x17   :  { %p123_p10 = pnand %p121_p9, %p118_p8 }
  0x19   :  { %126 = shalt.err (!%p123_p10)
}
  0x1a   :  { %s127_s4 = scalar_lea.vmem %s36_s24, 256  ;;  %p132_p12 = scmp.lt.s32.totalorder %s36_s24, %s36_s24 }
  0x1b   :  { %p128_p11 = scmp.ne.s32.totalorder %s36_s24, %s127_s4  ;;  %p133_p13 = scmp.lt.s32.totalorder %s127_s4, %s127_s4 }
  0x1d   :  { %p134_p0 = por %p133_p13, %p132_p12 }
  0x1f   :  { %p135_p1 = pnand %p134_p0, %p128_p11 }
  0x21   :  { %138 = shalt.err (!%p135_p1)
}
  0x22   :  { %41 = dma.hbm_to_vmem [thread:$0]  %s224_s1, 256, %s36_s24, [#allocation7], %s168_s19, %s168_s19, %s169_s20  }
  0x23   :  { %161 = dma.done.wait [#allocation4], 256  }
  0x24   :  { %162 = vsyncadd [#allocation4], 4294967040 }
  0x25   :  { %163 = dma.done.wait [#allocation7], 256  }
  0x26   :  { %164 = vsyncadd [#allocation7], 4294967040  ;;  %v57_v0 = vld [vmem:[#allocation3] sm:$0xff]  ;;  %v58_v1 = vld [vmem:[#allocation3 + $0x8] sm:$0xff]  ;;  %s171_s6 = smov [#allocation8]  }
  0x27   :  { %v59_v2 = vld [vmem:[#allocation6] sm:$0xff]  ;;  %v60_v3 = vld [vmem:[#allocation6 + $0x8] sm:$0xff]  ;;  %s80_s7 = sshll.u32 %s171_s6, 4  ;;  %s81_s7 = int_to_ptr.vmem [resolvable:$true] %s80_s7 }
  0x28   :  { %v61_v4 = vsub.f32 %v57_v0, %v59_v2  ;;  %v62_v5 = vsub.f32 %v58_v1, %v60_v3  ;;  %s139_s8 = scalar_lea.vmem %s81_s7, 128  ;;  %p144_p3 = scmp.lt.s32.totalorder %s81_s7, %s81_s7 }
  0x29   :  { %p140_p2 = scmp.ne.s32.totalorder %s81_s7, %s139_s8  ;;  %p145_p4 = scmp.lt.s32.totalorder %s139_s8, %s139_s8 }
  0x2a   :  { %v63_v6 = vmul.f32 %v61_v4, %v61_v4  ;;  %v64_v7 = vmul.f32 %v62_v5, %v62_v5 }
  0x2b   :  { %p146_p5 = por %p145_p4, %p144_p3 }
  0x2c   :  { %v66_v8 = vadd.f32 %v64_v7, %v63_v6 }
  0x2d   :  { %p147_p6 = pnand %p146_p5, %p140_p2 }
  0x2e   :  { %73 = vst [vmem:[#allocation8] sm:$0xff] %v66_v8 }
  0x2f   :  { %150 = shalt.err (!%p147_p6)
}
  0x30   :  { %s151_s10 = scalar_lea.hbm %s225_s2, 128 }
  0x31   :  { %p152_p7 = scmp.ne.s32.totalorder %s225_s2, %s151_s10  ;;  %p155_p8 = scmp.lt.u32.totalorder %s151_s10, %s225_s2 }
  0x33   :  { %p157_p9 = pnand %p155_p8, %p152_p7 }
  0x35   :  { %160 = shalt.err (!%p157_p9)
}
  0x36   :  { %83 = dma.vmem_to_hbm [thread:$0]  %s81_s7, 128, %s225_s2, [#allocation5]  }
  0x37   :  { %165 = dma.done.wait [#allocation5], 128  }
  0x38   :  { %166 = vsyncadd [#allocation5], 4294967168 }
  0x39   :  { %87 = vsyncpa [#allocation4], 1 }
  0x3a   :  { %88 = vsyncpa [#allocation7], 1 }
  0x3b   :  { %89 = vsyncpa [#allocation5], 1 }

</bundles_post_ra>
